<compile_context>
chip_gen: v7x
topology: tpu7x:2x2x1
jax: 0.10.0
libtpu: 0.0.40
codegen_flags: <defaults>
</compile_context>

<pallas_src>
import jax
import jax.numpy as jnp
from jax.experimental import pallas as pl
from jax.experimental.pallas import tpu as pltpu

INPUT_DIM = 3
LATENT_DIM = 64
HIDDEN = 256


def decoder_kernel(z_ref, x_ref, w1z_ref, w1x_ref, b1_ref,
                   w2_ref, b2_ref, w3_ref, b3_ref, o_ref):
    """One batch tile of: fc3(relu(fc2(relu(fc1([z, x])))))."""
    # fc1, z part: bf16 MXU matmul (z packed to bf16 on the VPU, hidden under
    # the MXU), f32 accumulate.
    z_bf = z_ref[...].astype(jnp.bfloat16)                       # (tb, 64)
    h = jnp.dot(z_bf, w1z_ref[...], preferred_element_type=jnp.float32)

    # fc1, x part (K=3): a (tb,3)x(3,256) dot would cost the same number of MXU
    # pushes as the K=64 dot (push count scales with M, not K), i.e. ~1/3 of all
    # MXU time for ~1% of the useful work.  Do it as 3 f32 broadcast-FMAs on the
    # VPU instead (VPU/XLU have slack under the MXU-bound critical path).
    x = x_ref[...]                                               # (tb, 3) f32
    for k in range(INPUT_DIM):
        h = h + x[:, k:k + 1] * w1x_ref[k:k + 1, :]
    h = jnp.maximum(h + b1_ref[...], 0.0)                        # f32 bias + ReLU

    # fc2 + ReLU: bf16 MXU operands, f32 accumulate.
    h = jnp.dot(h.astype(jnp.bfloat16), w2_ref[...],
                preferred_element_type=jnp.float32)
    h = jnp.maximum(h + b2_ref[...], 0.0)

    # fc3 (256 -> 1): VPU multiply + lane (XLU) reduce instead of an MXU pass
    # that would waste a full N-tile on a single output column.
    s = jnp.sum(h * w3_ref[...], axis=-1, keepdims=True)         # (tb, 1)
    # TODO(synk): a lane-dense (1, tb) output layout would replace the tb/8
    # masked vst.msk with unmasked stores; skipped here because the store slot
    # sits well under the MXU-bound critical path at these tile sizes and the
    # required sublane->lane relayout of the (tb,1) column is a lowering risk.
    o_ref[...] = s + b3_ref[...]


def _round_up(n, m):
    return ((n + m - 1) // m) * m


def _choose_tile(batch, max_tile=4096):
    """Batch-tile rows: big tiles to amortize the ~0.35 us per-grid-step cost,
    but at least two tiles for medium/large batches so both v7x TensorCores are
    fed.  Always a multiple of 8 (f32 sublane); partial tiles are masked by
    Pallas."""
    if batch <= 256:
        return max(8, _round_up(batch, 8))            # single small tile
    half = _round_up(pl.cdiv(batch, 2), 16)           # guarantee >= 2 tiles
    return min(max_tile, half)


def prepare_params(params):
    """One-time weight layout / casting (do NOT re-run per forward call):
    fc1 is split into its z / x halves, MXU operands go to bf16, everything
    else stays f32 and is reshaped to 2-D kernel layout."""
    w1, b1, w2, b2, w3, b3 = params
    w1z = w1[:LATENT_DIM].astype(jnp.bfloat16)                  # (64, 256)  MXU
    w1x = w1[LATENT_DIM:].astype(jnp.float32)                   # (3, 256)   VPU FMAs
    b1_2d = jnp.reshape(b1, (1, HIDDEN)).astype(jnp.float32)
    w2_bf = w2.astype(jnp.bfloat16)                             # (256, 256) MXU
    b2_2d = jnp.reshape(b2, (1, HIDDEN)).astype(jnp.float32)
    w3_row = jnp.reshape(w3, (1, HIDDEN)).astype(jnp.float32)
    b3_2d = jnp.reshape(b3, (1, 1)).astype(jnp.float32)
    return (w1z, w1x, b1_2d, w2_bf, b2_2d, w3_row, b3_2d)


def decoder_forward(z, x, prepared, *, tile_rows=None):
    """3-layer MLP decoder as a single batch-tiled Pallas kernel.

    z: (B, 64) f32 and x: (B, 3) f32 are read from HBM exactly once (no
    wrapper-side cast/concat passes); weights come from prepare_params().
    """
    w1z, w1x, b1, w2, b2, w3, b3 = prepared
    B = z.shape[0]
    tb = _choose_tile(B) if tile_rows is None else tile_rows
    grid = (pl.cdiv(B, tb),)

    const2d = lambda i: (0, 0)
    in_specs = [
        pl.BlockSpec((tb, LATENT_DIM), lambda i: (i, 0)),       # z tile
        pl.BlockSpec((tb, INPUT_DIM), lambda i: (i, 0)),        # x tile
        pl.BlockSpec((LATENT_DIM, HIDDEN), const2d),            # w1z (resident)
        pl.BlockSpec((INPUT_DIM, HIDDEN), const2d),             # w1x (resident)
        pl.BlockSpec((1, HIDDEN), const2d),                     # b1
        pl.BlockSpec((HIDDEN, HIDDEN), const2d),                # w2  (resident)
        pl.BlockSpec((1, HIDDEN), const2d),                     # b2
        pl.BlockSpec((1, HIDDEN), const2d),                     # w3 row
        pl.BlockSpec((1, 1), const2d),                          # b3
    ]
    out_spec = pl.BlockSpec((tb, 1), lambda i: (i, 0))

    return pl.pallas_call(
        decoder_kernel,
        out_shape=jax.ShapeDtypeStruct((B, 1), jnp.float32),
        grid=grid,
        in_specs=in_specs,
        out_specs=out_spec,
        compiler_params=pltpu.CompilerParams(
            # independent batch tiles -> TC sharding where available
            dimension_semantics=("parallel",),
            # tb=4096 keeps roughly 25-30 MiB live (double-buffered z/x/out
            # tiles + f32 intermediates); raise the scoped limit above v5e's
            # 16 MiB default while staying well under every generation's
            # physical VMEM (v7x: 64 MiB).
            vmem_limit_bytes=48 * 1024 * 1024),
    )(z, x, w1z, w1x, b1, w2, b2, w3, b3)


def init_params(key):
    """Deterministic init mimicking nn.Linear (uniform +/- 1/sqrt(fan_in))."""
    def linear(key, fan_in, fan_out):
        kw, kb = jax.random.split(key)
        bound = 1.0 / jnp.sqrt(fan_in)
        w = jax.random.uniform(kw, (fan_in, fan_out), jnp.float32, -bound, bound)
        b = jax.random.uniform(kb, (1, fan_out), jnp.float32, -bound, bound)
        return w, b

    k1, k2, k3 = jax.random.split(key, 3)
    w1, b1 = linear(k1, LATENT_DIM + INPUT_DIM, HIDDEN)
    w2, b2 = linear(k2, HIDDEN, HIDDEN)
    w3, b3 = linear(k3, HIDDEN, 1)
    return (w1, b1, w2, b2, w3, b3)


def decoder_ref(z, x, params):
    w1, b1, w2, b2, w3, b3 = params
    zx = jnp.concatenate([z, x], axis=-1)
    h = jnp.maximum(zx @ w1 + b1, 0.0)
    h = jnp.maximum(h @ w2 + b2, 0.0)
    return h @ w3 + b3


if __name__ == "__main__":
    key = jax.random.PRNGKey(0)
    kp, kz, kx, kz2, kx2 = jax.random.split(key, 5)

    params = init_params(kp)
    prepared = prepare_params(params)      # one-time weight prep (hoisted)

    # Small test: single tile (tb == B == 8, so no over-sized block).
    B = 8
    z = jax.random.normal(kz, (B, LATENT_DIM), jnp.float32)
    x = jax.random.normal(kx, (B, INPUT_DIM), jnp.float32)
    out = jax.block_until_ready(decoder_forward(z, x, prepared))
    ref = decoder_ref(z, x, params)
    assert out.shape == (B, 1)
    # bf16 MXU operands -> loosened tolerance vs. the f32 reference.
    assert jnp.allclose(out, ref, atol=5e-2, rtol=5e-2)

    # Multi-tile test exercising grid > 1 and a masked partial last tile.
    B2 = 200
    z2 = jax.random.normal(kz2, (B2, LATENT_DIM), jnp.float32)
    x2 = jax.random.normal(kx2, (B2, INPUT_DIM), jnp.float32)
    out2 = jax.block_until_ready(decoder_forward(z2, x2, prepared, tile_rows=64))
    ref2 = decoder_ref(z2, x2, params)
    assert out2.shape == (B2, 1)
    assert jnp.allclose(out2, ref2, atol=5e-2, rtol=5e-2)

    print("KERNEL_OK")
</pallas_src>

<mosaic_0001>
module attributes {stable_mosaic.version = 11 : i64} {
  func.func @decoder_kernel(%arg0: i32, %arg1: memref<8x64xf32, #tpu.memory_space<vmem>>, %arg2: memref<8x3xf32, #tpu.memory_space<vmem>>, %arg3: memref<64x256xbf16, #tpu.memory_space<vmem>>, %arg4: memref<3x256xf32, #tpu.memory_space<vmem>>, %arg5: memref<1x256xf32, #tpu.memory_space<vmem>>, %arg6: memref<256x256xbf16, #tpu.memory_space<vmem>>, %arg7: memref<1x256xf32, #tpu.memory_space<vmem>>, %arg8: memref<1x256xf32, #tpu.memory_space<vmem>>, %arg9: memref<1x1xf32, #tpu.memory_space<vmem>>, %arg10: memref<8x1xf32, #tpu.memory_space<vmem>>) attributes {dimension_semantics = [#tpu.dimension_semantics<parallel>], iteration_bounds = array<i64: 1>, scalar_prefetch = 0 : i64, scratch_operands = 0 : i64, tpu.core_type = #tpu.core_type<tc>, window_params = [{transform_indices = @transform_0, window_bounds = array<i64: 8, 64>}, {transform_indices = @transform_1, window_bounds = array<i64: 8, 3>}, {pipeline_mode = #tpu.pipeline_mode<synchronous>, transform_indices = @transform_2, window_bounds = array<i64: 64, 256>}, {pipeline_mode = #tpu.pipeline_mode<synchronous>, transform_indices = @transform_3, window_bounds = array<i64: 3, 256>}, {pipeline_mode = #tpu.pipeline_mode<synchronous>, transform_indices = @transform_4, window_bounds = array<i64: 1, 256>}, {pipeline_mode = #tpu.pipeline_mode<synchronous>, transform_indices = @transform_5, window_bounds = array<i64: 256, 256>}, {pipeline_mode = #tpu.pipeline_mode<synchronous>, transform_indices = @transform_6, window_bounds = array<i64: 1, 256>}, {pipeline_mode = #tpu.pipeline_mode<synchronous>, transform_indices = @transform_7, window_bounds = array<i64: 1, 256>}, {pipeline_mode = #tpu.pipeline_mode<synchronous>, transform_indices = @transform_8, window_bounds = array<i64: 1, 1>}, {transform_indices = @transform_9, window_bounds = array<i64: 8, 1>}]} {
    %c0 = arith.constant 0 : index
    %c0_0 = arith.constant 0 : index
    %0 = vector.load %arg1[%c0, %c0_0] : memref<8x64xf32, #tpu.memory_space<vmem>>, vector<8x64xf32>
    %1 = arith.truncf %0 : vector<8x64xf32> to vector<8x64xbf16>
    %c0_1 = arith.constant 0 : index
    %c0_2 = arith.constant 0 : index
    %2 = vector.load %arg3[%c0_1, %c0_2] : memref<64x256xbf16, #tpu.memory_space<vmem>>, vector<64x256xbf16>
    %cst = arith.constant dense<0.000000e+00> : vector<8x256xf32>
    %3 = tpu.matmul %1, %2, %cst {dimension_numbers = #tpu.dot_dimension_numbers<[1], [0], [0], [1], [0, 0, 1, 1], [], []>} : vector<8x64xbf16>, vector<64x256xbf16>, vector<8x256xf32> -> vector<8x256xf32>
    %c0_3 = arith.constant 0 : index
    %c0_4 = arith.constant 0 : index
    %4 = vector.load %arg2[%c0_3, %c0_4] : memref<8x3xf32, #tpu.memory_space<vmem>>, vector<8x3xf32>
    %5 = vector.extract_strided_slice %4 {offsets = [0, 0], sizes = [8, 1], strides = [1, 1]} : vector<8x3xf32> to vector<8x1xf32>
    %c0_5 = arith.constant 0 : index
    %c0_6 = arith.constant 0 : index
    %6 = vector.load %arg4[%c0_5, %c0_6] : memref<3x256xf32, #tpu.memory_space<vmem>>, vector<1x256xf32>
    %7 = vector.broadcast %5 : vector<8x1xf32> to vector<8x256xf32>
    %8 = vector.broadcast %6 : vector<1x256xf32> to vector<8x256xf32>
    %9 = arith.mulf %7, %8 : vector<8x256xf32>
    %10 = arith.addf %3, %9 : vector<8x256xf32>
    %11 = vector.extract_strided_slice %4 {offsets = [0, 1], sizes = [8, 1], strides = [1, 1]} : vector<8x3xf32> to vector<8x1xf32>
    %c1 = arith.constant 1 : index
    %c0_7 = arith.constant 0 : index
    %12 = vector.load %arg4[%c1, %c0_7] : memref<3x256xf32, #tpu.memory_space<vmem>>, vector<1x256xf32>
    %13 = vector.broadcast %11 : vector<8x1xf32> to vector<8x256xf32>
    %14 = vector.broadcast %12 : vector<1x256xf32> to vector<8x256xf32>
    %15 = arith.mulf %13, %14 : vector<8x256xf32>
    %16 = arith.addf %10, %15 : vector<8x256xf32>
    %17 = vector.extract_strided_slice %4 {offsets = [0, 2], sizes = [8, 1], strides = [1, 1]} : vector<8x3xf32> to vector<8x1xf32>
    %c2 = arith.constant 2 : index
    %c0_8 = arith.constant 0 : index
    %18 = vector.load %arg4[%c2, %c0_8] : memref<3x256xf32, #tpu.memory_space<vmem>>, vector<1x256xf32>
    %19 = vector.broadcast %17 : vector<8x1xf32> to vector<8x256xf32>
    %20 = vector.broadcast %18 : vector<1x256xf32> to vector<8x256xf32>
    %21 = arith.mulf %19, %20 : vector<8x256xf32>
    %22 = arith.addf %16, %21 : vector<8x256xf32>
    %c0_9 = arith.constant 0 : index
    %c0_10 = arith.constant 0 : index
    %23 = vector.load %arg5[%c0_9, %c0_10] : memref<1x256xf32, #tpu.memory_space<vmem>>, vector<1x256xf32>
    %24 = vector.broadcast %23 : vector<1x256xf32> to vector<8x256xf32>
    %25 = arith.addf %22, %24 : vector<8x256xf32>
    %cst_11 = arith.constant 0.000000e+00 : f32
    %26 = vector.broadcast %cst_11 : f32 to vector<8x256xf32>
    %27 = arith.maximumf %25, %26 : vector<8x256xf32>
    %28 = arith.truncf %27 : vector<8x256xf32> to vector<8x256xbf16>
    %c0_12 = arith.constant 0 : index
    %c0_13 = arith.constant 0 : index
    %29 = vector.load %arg6[%c0_12, %c0_13] : memref<256x256xbf16, #tpu.memory_space<vmem>>, vector<256x256xbf16>
    %cst_14 = arith.constant dense<0.000000e+00> : vector<8x256xf32>
    %30 = tpu.matmul %28, %29, %cst_14 {dimension_numbers = #tpu.dot_dimension_numbers<[1], [0], [0], [1], [0, 0, 1, 1], [], []>} : vector<8x256xbf16>, vector<256x256xbf16>, vector<8x256xf32> -> vector<8x256xf32>
    %c0_15 = arith.constant 0 : index
    %c0_16 = arith.constant 0 : index
    %31 = vector.load %arg7[%c0_15, %c0_16] : memref<1x256xf32, #tpu.memory_space<vmem>>, vector<1x256xf32>
    %32 = vector.broadcast %31 : vector<1x256xf32> to vector<8x256xf32>
    %33 = arith.addf %30, %32 : vector<8x256xf32>
    %cst_17 = arith.constant 0.000000e+00 : f32
    %34 = vector.broadcast %cst_17 : f32 to vector<8x256xf32>
    %35 = arith.maximumf %33, %34 : vector<8x256xf32>
    %c0_18 = arith.constant 0 : index
    %c0_19 = arith.constant 0 : index
    %36 = vector.load %arg8[%c0_18, %c0_19] : memref<1x256xf32, #tpu.memory_space<vmem>>, vector<1x256xf32>
    %37 = vector.broadcast %36 : vector<1x256xf32> to vector<8x256xf32>
    %38 = arith.mulf %35, %37 : vector<8x256xf32>
    %cst_20 = arith.constant dense<0.000000e+00> : vector<8xf32>
    %39 = vector.multi_reduction <add>, %38, %cst_20 [1] : vector<8x256xf32> to vector<8xf32>
    %40 = vector.shape_cast %39 : vector<8xf32> to vector<8x1xf32>
    %c0_21 = arith.constant 0 : index
    %c0_22 = arith.constant 0 : index
    %41 = vector.load %arg9[%c0_21, %c0_22] : memref<1x1xf32, #tpu.memory_space<vmem>>, vector<1x1xf32>
    %42 = vector.broadcast %41 : vector<1x1xf32> to vector<8x1xf32>
    %43 = arith.addf %40, %42 : vector<8x1xf32>
    %c0_23 = arith.constant 0 : index
    %c0_24 = arith.constant 0 : index
    %44 = vector.load %arg10[%c0_23, %c0_24] : memref<8x1xf32, #tpu.memory_space<vmem>>, vector<8x1xf32>
    tpu.vector_store %arg10[%c0_23, %c0_24], %43 {strides = array<i32>} : memref<8x1xf32, #tpu.memory_space<vmem>>, vector<8x1xf32>,
    return
  }
  func.func @transform_0(%arg0: i32) -> (i32, i32) {
    %c0_i32 = arith.constant 0 : i32
    %c0_i32_0 = arith.constant 0 : i32
    return %arg0, %c0_i32 : i32, i32
  }
  func.func @transform_1(%arg0: i32) -> (i32, i32) {
    %c0_i32 = arith.constant 0 : i32
    %c0_i32_0 = arith.constant 0 : i32
    return %arg0, %c0_i32 : i32, i32
  }
  func.func @transform_2(%arg0: i32) -> (i32, i32) {
    %c0_i32 = arith.constant 0 : i32
    %c0_i32_0 = arith.constant 0 : i32
    %c0_i32_1 = arith.constant 0 : i32
    return %c0_i32, %c0_i32_0 : i32, i32
  }
  func.func @transform_3(%arg0: i32) -> (i32, i32) {
    %c0_i32 = arith.constant 0 : i32
    %c0_i32_0 = arith.constant 0 : i32
    %c0_i32_1 = arith.constant 0 : i32
    return %c0_i32, %c0_i32_0 : i32, i32
  }
  func.func @transform_4(%arg0: i32) -> (i32, i32) {
    %c0_i32 = arith.constant 0 : i32
    %c0_i32_0 = arith.constant 0 : i32
    %c0_i32_1 = arith.constant 0 : i32
    return %c0_i32, %c0_i32_0 : i32, i32
  }
  func.func @transform_5(%arg0: i32) -> (i32, i32) {
    %c0_i32 = arith.constant 0 : i32
    %c0_i32_0 = arith.constant 0 : i32
    %c0_i32_1 = arith.constant 0 : i32
    return %c0_i32, %c0_i32_0 : i32, i32
  }
  func.func @transform_6(%arg0: i32) -> (i32, i32) {
    %c0_i32 = arith.constant 0 : i32
    %c0_i32_0 = arith.constant 0 : i32
    %c0_i32_1 = arith.constant 0 : i32
    return %c0_i32, %c0_i32_0 : i32, i32
  }
  func.func @transform_7(%arg0: i32) -> (i32, i32) {
    %c0_i32 = arith.constant 0 : i32
    %c0_i32_0 = arith.constant 0 : i32
    %c0_i32_1 = arith.constant 0 : i32
    return %c0_i32, %c0_i32_0 : i32, i32
  }
  func.func @transform_8(%arg0: i32) -> (i32, i32) {
    %c0_i32 = arith.constant 0 : i32
    %c0_i32_0 = arith.constant 0 : i32
    %c0_i32_1 = arith.constant 0 : i32
    return %c0_i32, %c0_i32_0 : i32, i32
  }
  func.func @transform_9(%arg0: i32) -> (i32, i32) {
    %c0_i32 = arith.constant 0 : i32
    %c0_i32_0 = arith.constant 0 : i32
    return %arg0, %c0_i32 : i32, i32
  }
}

</mosaic_0001>

<bundles_post_ra>
// kernel: tpu_custom_call.1
= control target key start
LH: loop header
LB: loop body
LE: loop exit
PB: predicated region body
PF: predicated region fallthrough
CT: control target
= control target key end

     0   :  { %s792_s0 = inlined_call_operand.vmem [shape: f32[8,64], index: 0, kind: input, shape index: {}]   ;;  %s793_s1 = inlined_call_operand.vmem [shape: f32[8,3], index: 1, kind: input, shape index: {}]   ;;  %s794_s2 = inlined_call_operand.hbm [shape: bf16[64,256], index: 2, kind: input, shape index: {}]   ;;  %s795_s3 = inlined_call_operand.vmem [shape: f32[3,256], index: 3, kind: input, shape index: {}]   ;;  %s796_s4 = inlined_call_operand.vmem [shape: f32[1,256], index: 4, kind: input, shape index: {}]   ;;  %s797_s5 = inlined_call_operand.hbm [shape: bf16[256,256], index: 5, kind: input, shape index: {}]   ;;  %s798_s6 = inlined_call_operand.vmem [shape: f32[1,256], index: 6, kind: input, shape index: {}]   ;;  %s799_s7 = inlined_call_operand.vmem [shape: f32[1,256], index: 7, kind: input, shape index: {}]   ;;  %s800_s8 = inlined_call_operand.<no memory space> [shape: f32[1,1], index: 8, kind: input, shape index: {}]   ;;  %s801_s9 = inlined_call_operand.vmem [shape: f32[8,1], index: 9, kind: output, shape index: {}]  }
   0x1   :  { %v14_v0 = vstv %s800_s8 }
   0x2   :  { %15 = vst [vmem:[#allocation2] sm:$0x1] %v14_v0 }
   0x3   :  { %16 = vsyncpa [#allocation4], 0 }
   0x4   :  { %17 = vsyncpa [#allocation6], 0  ;;  %s681_s11 = smov [#allocation3]   ;;  %s633_s15 = scalar_lea.hbm %s794_s2, 1024 }
   0x5   :  { %s27_s12 = sshll.u32 %s681_s11, 4  ;;  %p634_p0 = scmp.ne.s32.totalorder %s794_s2, %s633_s15  ;;  %s28_s12 = int_to_ptr.vmem [resolvable:$true] %s27_s12 }
   0x6   :  { %p637_p1 = scmp.lt.u32.totalorder %s633_s15, %s794_s2 }
   0x8   :  { %p639_p2 = pnand %p637_p1, %p634_p0 }
   0xa   :  { %642 = shalt.err (!%p639_p2)
}
   0xb   :  { %s643_s8 = scalar_lea.vmem %s28_s12, 1024  ;;  %p648_p4 = scmp.lt.s32.totalorder %s28_s12, %s28_s12 }
   0xc   :  { %p644_p3 = scmp.ne.s32.totalorder %s28_s12, %s643_s8  ;;  %p649_p5 = scmp.lt.s32.totalorder %s643_s8, %s643_s8 }
   0xe   :  { %p650_p6 = por %p649_p5, %p648_p4 }
  0x10   :  { %p651_p7 = pnand %p650_p6, %p644_p3 }
  0x12   :  { %654 = shalt.err (!%p651_p7)
}
  0x13   :  { %s682_s20 = smov 128   ;;  %s683_s21 = smov 8  }
  0x14   :  { %33 = dma.hbm_to_vmem [thread:$0]  %s794_s2, 1024, %s28_s12, [#allocation4], %s682_s20, %s682_s20, %s683_s21  }
  0x15   :  { %s684_s24 = smov [#allocation5]   ;;  %s655_s28 = scalar_lea.hbm %s797_s5, 4096 }
  0x16   :  { %s43_s25 = sshll.u32 %s684_s24, 4  ;;  %p656_p8 = scmp.ne.s32.totalorder %s797_s5, %s655_s28  ;;  %s44_s25 = int_to_ptr.vmem [resolvable:$true] %s43_s25 }
  0x17   :  { %p659_p9 = scmp.lt.u32.totalorder %s655_s28, %s797_s5 }
  0x19   :  { %p661_p10 = pnand %p659_p9, %p656_p8 }
  0x1b   :  { %664 = shalt.err (!%p661_p10)
}
  0x1c   :  { %s665_s13 = scalar_lea.vmem %s44_s25, 4096  ;;  %p670_p12 = scmp.lt.s32.totalorder %s44_s25, %s44_s25 }
  0x1d   :  { %p666_p11 = scmp.ne.s32.totalorder %s44_s25, %s665_s13  ;;  %p671_p13 = scmp.lt.s32.totalorder %s665_s13, %s665_s13 }
  0x1f   :  { %p672_p0 = por %p671_p13, %p670_p12 }
  0x21   :  { %p673_p1 = pnand %p672_p0, %p666_p11 }
  0x23   :  { %676 = shalt.err (!%p673_p1)
}
  0x24   :  { %49 = dma.hbm_to_vmem [thread:$0]  %s797_s5, 4096, %s44_s25, [#allocation6], %s682_s20, %s682_s20, %s683_s21  }
  0x25   :  { %677 = dma.done.wait [#allocation4], 1024  }
  0x26   :  { %678 = vsyncadd [#allocation4], 4294966272 }
  0x27   :  { %679 = dma.done.wait [#allocation6], 4096  }
  0x28   :  { %680 = vsyncadd [#allocation6], 4294963200  ;;  %v685_v1 = vmov 0   ;;  %v686_v2 = vmov 2   ;;  %v573_v3 = vld [vmem:[#allocation3 + $0x4] ss:$8 sps:$4 sm:$0xff]   ;;  %v81_v47 = vlaneseq }
  0x29   :  { %169 = vmatprep.mubr.bf16.mxu0 %v685_v1  ;;  %569 = vset.pattern.permute.xlu0 %v685_v1  ;;  %v575_v4 = vld [vmem:[#allocation3] ss:$8 sps:$4 sm:$0xff]   ;;  %v576_v5 = vld [vmem:[#allocation3 + $0x14] ss:$8 sps:$4 sm:$0xff]   ;;  %v578_v6 = vld [vmem:[#allocation3 + $0x10] ss:$8 sps:$4 sm:$0xff]  }
  0x2a   :  { %571 = vset.pattern.permute.xlu1 %v686_v2  ;;  %137 = vmatprep.subr.bf16.mxu0 %v573_v3  ;;  %v579_v7 = vld [vmem:[#allocation3 + $0x24] ss:$8 sps:$4 sm:$0xff]   ;;  %v581_v8 = vld [vmem:[#allocation3 + $0x20] ss:$8 sps:$4 sm:$0xff]   ;;  %v582_v12 = vld [vmem:[#allocation3 + $0x34] ss:$8 sps:$4 sm:$0xff]  }
  0x2b   :  { %138 = vmatpush1.bf16.msra.mxu0 %v575_v4  ;;  %v73_v9 = vld [vmem:[%s793_s1] sm:$0xff]  ;;  %v584_v14 = vld [vmem:[#allocation3 + $0x30] ss:$8 sps:$4 sm:$0xff]   ;;  %v687_v16 = vmov 1   ;;  %vm133_vm0 = vcmask 523264   ;;  %v82_v48 = vshrl.u32 %v81_v47, 7 }
  0x2c   :  { %139 = vmatprep.subr.bf16.mxu0 %v576_v5  ;;  %77 = vperm.xlu0 %569, %v73_v9   ;;  %v585_v10 = vld [vmem:[#allocation5 + $0x4] ss:$8 sps:$4 sm:$0xff]   ;;  %v587_v11 = vld [vmem:[#allocation5] ss:$8 sps:$4 sm:$0xff]   ;;  %v588_v13 = vld [vmem:[#allocation5 + $0x14] ss:$8 sps:$4 sm:$0xff]  }
  0x2d   :  { %202 = vperm.xlu1 %571, %v73_v9   ;;  %442 = vmatprep.subr.bf16.mxu1 %v585_v10  ;;  %v590_v15 = vld [vmem:[#allocation5 + $0x10] ss:$8 sps:$4 sm:$0xff]   ;;  %v591_v17 = vld [vmem:[#allocation5 + $0x24] ss:$8 sps:$4 sm:$0xff]   ;;  %v593_v19 = vld [vmem:[#allocation5 + $0x20] ss:$8 sps:$4 sm:$0xff]  }
  0x2e   :  { %443 = vmatpush1.bf16.msra.mxu1 %v587_v11  ;;  %v63_v18 = vld [vmem:[%s792_s0] sm:$0xff]  ;;  %v596_v22 = vld [vmem:[#allocation5 + $0x30] ss:$8 sps:$4 sm:$0xff]   ;;  %v83_v50 = vsub.s32 0, %v82_v48  ;;  %v87_v51 = vsub.s32 1, %v82_v48  ;;  %vm510_vm1 = vcmask 7168  }
  0x2f   :  { %140 = vmatpush1.bf16.msra.mxu0 %v578_v6  ;;  %444 = vmatprep.subr.bf16.mxu1 %v588_v13  ;;  %v64_v20 = vpack.c.bf16 %v63_v18, %v63_v18  ;;  %v594_v21 = vld [vmem:[#allocation5 + $0x34] ss:$8 sps:$4 sm:$0xff]   ;;  %v597_v23 = vld [vmem:[#allocation5 + $0x44] ss:$8 sps:$4 sm:$0xff]   ;;  %v599_v24 = vld [vmem:[#allocation5 + $0x40] ss:$8 sps:$4 sm:$0xff]  }
  0x30   :  { %141 = vmatprep.subr.bf16.mxu0 %v579_v7  ;;  %570 = vset.pattern.permute.xlu0 %v687_v16  ;;  %v600_v25 = vld [vmem:[#allocation5 + $0x54] ss:$8 sps:$4 sm:$0xff]   ;;  %v602_v26 = vld [vmem:[#allocation5 + $0x50] ss:$8 sps:$4 sm:$0xff]   ;;  %v603_v27 = vld [vmem:[#allocation5 + $0x64] ss:$8 sps:$4 sm:$0xff]  }
  0x31   :  { %181 = vperm.xlu0 %570, %v73_v9   ;;  %v605_v28 = vld [vmem:[#allocation5 + $0x60] ss:$8 sps:$4 sm:$0xff]   ;;  %v606_v29 = vld [vmem:[#allocation5 + $0x74] ss:$8 sps:$4 sm:$0xff]   ;;  %v608_v30 = vld [vmem:[#allocation5 + $0x70] ss:$8 sps:$4 sm:$0xff]  }
  0x32   :  { %445 = vmatpush1.bf16.msra.mxu1 %v590_v15  ;;  %v609_v31 = vld [vmem:[#allocation5 + $0x84] ss:$8 sps:$4 sm:$0xff]   ;;  %v611_v32 = vld [vmem:[#allocation5 + $0x80] ss:$8 sps:$4 sm:$0xff]   ;;  %v612_v33 = vld [vmem:[#allocation5 + $0x94] ss:$8 sps:$4 sm:$0xff]  }
  0x33   :  { %142 = vmatpush1.bf16.msra.mxu0 %v581_v8  ;;  %446 = vmatprep.subr.bf16.mxu1 %v591_v17  ;;  %v614_v34 = vld [vmem:[#allocation5 + $0x90] ss:$8 sps:$4 sm:$0xff]   ;;  %v615_v35 = vld [vmem:[#allocation5 + $0xa4] ss:$8 sps:$4 sm:$0xff]   ;;  %v617_v36 = vld [vmem:[#allocation5 + $0xa0] ss:$8 sps:$4 sm:$0xff]  }
  0x34   :  { %143 = vmatprep.subr.bf16.mxu0 %v582_v12  ;;  %v618_v37 = vld [vmem:[#allocation5 + $0xb4] ss:$8 sps:$4 sm:$0xff]   ;;  %v620_v38 = vld [vmem:[#allocation5 + $0xb0] ss:$8 sps:$4 sm:$0xff]   ;;  %v621_v39 = vld [vmem:[#allocation5 + $0xc4] ss:$8 sps:$4 sm:$0xff]  }
  0x35   :  { %572 = vset.pattern.permute.xlu0 %v686_v2  ;;  %v623_v40 = vld [vmem:[#allocation5 + $0xc0] ss:$8 sps:$4 sm:$0xff]   ;;  %v624_v41 = vld [vmem:[#allocation5 + $0xd4] ss:$8 sps:$4 sm:$0xff]   ;;  %v626_v42 = vld [vmem:[#allocation5 + $0xd0] ss:$8 sps:$4 sm:$0xff]  }
  0x36   :  { %447 = vmatpush1.bf16.msra.mxu1 %v593_v19  ;;  %v627_v43 = vld [vmem:[#allocation5 + $0xe4] ss:$8 sps:$4 sm:$0xff]   ;;  %v629_v44 = vld [vmem:[#allocation5 + $0xe0] ss:$8 sps:$4 sm:$0xff]   ;;  %v630_v45 = vld [vmem:[#allocation5 + $0xf4] ss:$8 sps:$4 sm:$0xff]  }
  0x37   :  { %144 = vmatpush1.bf16.msra.mxu0 %v584_v14  ;;  %448 = vmatprep.subr.bf16.mxu1 %v594_v21  ;;  %v632_v46 = vld [vmem:[#allocation5 + $0xf0] ss:$8 sps:$4 sm:$0xff]   ;;  %v74_v52 = vld [vmem:[%s795_s3] ss:$4 sm:$0x3] }
  0x38   :  { %v527_v53 = vld [vmem:[%s795_s3 + $0x1] ss:$4 sm:$0x3]  ;;  %v528_v54 = vld [vmem:[%s795_s3 + $0x2] ss:$4 sm:$0x3]  ;;  %v84_v55 = vrot.slane %v74_v52, %v83_v50  ;;  %v88_v57 = vrot.slane %v74_v52, %v87_v51 }
  0x39   :  { %v188_v56 = vrot.slane %v527_v53, %v83_v50  ;;  %v192_v58 = vrot.slane %v527_v53, %v87_v51  ;;  %v209_v60 = vrot.slane %v528_v54, %v83_v50  ;;  %v213_v61 = vrot.slane %v528_v54, %v87_v51  ;;  %v220_v4 = vld [vmem:[%s796_s4] sm:$0x3] }
  0x3a   :  { %526 = vmatmul.mubr.msk.bf16.vlgmr.msra.gmra.mrb[0].mxu0 %vm133_vm0, %v64_v20  ;;  %449 = vmatpush1.bf16.msra.mxu1 %v596_v22  ;;  %v225_v13 = vrot.slane %v220_v4, %v83_v50  ;;  %v229_v15 = vrot.slane %v220_v4, %v87_v51 }
  0x3b   :  { %450 = vmatprep.subr.bf16.mxu1 %v597_v23 }
  0x3e   :  { %451 = vmatpush1.bf16.msra.mxu1 %v599_v24  ;;  %v270_v24 = vld [vmem:[%s798_s6] sm:$0x3] }
  0x3f   :  { %452 = vmatprep.subr.bf16.mxu1 %v600_v25  ;;  %v275_v25 = vrot.slane %v270_v24, %v83_v50 }
  0x42   :  { %453 = vmatpush1.bf16.msra.mxu1 %v602_v26  ;;  %v485_v26 = vld [vmem:[%s799_s7] sm:$0x3] }
  0x43   :  { %454 = vmatprep.subr.bf16.mxu1 %v603_v27  ;;  %v279_v27 = vrot.slane %v270_v24, %v87_v51 }
  0x46   :  { %455 = vmatpush1.bf16.msra.mxu1 %v605_v28 }
  0x47   :  { %456 = vmatprep.subr.bf16.mxu1 %v606_v29 }
  0x4a   :  { %457 = vmatpush1.bf16.msra.mxu1 %v608_v30  ;;  %v490_v30 = vrot.slane %v485_v26, %v83_v50 }
  0x4b   :  { %458 = vmatprep.subr.bf16.mxu1 %v609_v31 }
  0x4e   :  { %459 = vmatpush1.bf16.msra.mxu1 %v611_v32 }
  0x4f   :  { %460 = vmatprep.subr.bf16.mxu1 %v612_v33  ;;  %v494_v33 = vrot.slane %v485_v26, %v87_v51 }
  0x52   :  { %461 = vmatpush1.bf16.msra.mxu1 %v614_v34 }
  0x53   :  { %462 = vmatprep.subr.bf16.mxu1 %v615_v35 }
  0x56   :  { %463 = vmatpush1.bf16.msra.mxu1 %v617_v36 }
  0x57   :  { %464 = vmatprep.subr.bf16.mxu1 %v618_v37 }
  0x5a   :  { %465 = vmatpush1.bf16.msra.mxu1 %v620_v38 }
  0x5b   :  { %466 = vmatprep.subr.bf16.mxu1 %v621_v39 }
  0x5e   :  { %467 = vmatpush1.bf16.msra.mxu1 %v623_v40 }
  0x5f   :  { %468 = vmatprep.subr.bf16.mxu1 %v624_v41  ;;  %v561_v41 = vld [vmem:[#allocation2] ss:$0 sm:$0xff] }
  0x62   :  { %469 = vmatpush1.bf16.msra.mxu1 %v626_v42 }
  0x63   :  { %470 = vmatprep.subr.bf16.mxu1 %v627_v43 }
  0x66   :  { %471 = vmatpush1.bf16.msra.mxu1 %v629_v44 }
  0x67   :  { %472 = vmatprep.subr.bf16.mxu1 %v630_v45 }
  0x6a   :  { %473 = vmatpush1.bf16.msra.mxu1 %v632_v46 }
  0xab   :  { %v78_v49 = vpop.permute.xlu0 %77 }
  0xac   :  { %v203_v62 = vpop.permute.xlu1 %202  ;;  %v91_v63 = vmul.f32 %v84_v55, %v78_v49  ;;  %v92_v1 = vmul.f32 %v88_v57, %v78_v49 }
  0xad   :  { %v216_v7 = vmul.f32 %v209_v60, %v203_v62  ;;  %v217_v9 = vmul.f32 %v213_v61, %v203_v62 }
  0xb0   :  { %v182_v59 = vpop.permute.xlu0 %181 }
  0xb1   :  { %v195_v0 = vmul.f32 %v188_v56, %v182_v59  ;;  %v196_v2 = vmul.f32 %v192_v58, %v182_v59 }
 0x10d   :  { %v171_v3 = vpop.f32.mrb[0].mxu0 }
 0x10e   :  { %v172_v5 = vadd.f32 %v171_v3, %v91_v63  ;;  %v173_v6 = vpop.f32.mrb[1].mxu0 }
 0x10f   :  { %v174_v8 = vadd.f32 %v173_v6, %v92_v1  ;;  %v175_v10 = vpop.f32.mrb[2].mxu0 }
 0x110   :  { %v197_v11 = vadd.f32 %v195_v0, %v172_v5  ;;  %v176_v12 = vpop.f32.mrb[3].mxu0 }
 0x111   :  { %v198_v14 = vadd.f32 %v196_v2, %v174_v8 }
 0x112   :  { %v218_v16 = vadd.f32 %v216_v7, %v197_v11 }
 0x113   :  { %v219_v17 = vadd.f32 %v217_v9, %v198_v14 }
 0x114   :  { %v232_v18 = vadd.f32 %v225_v13, %v218_v16 }
 0x115   :  { %v233_v19 = vadd.f32 %v229_v15, %v219_v17 }
 0x116   :  { %v234_v20 = vmax.f32 %v232_v18, 0.0 }
 0x117   :  { %v235_v21 = vmax.f32 %v233_v19, 0.0 }
 0x118   :  { %v236_v23 = vpack.c.bf16 %v234_v20, %v234_v20 }
 0x119   :  { %v237_v22 = vpack.c.bf16 %v235_v21, %v235_v21 }
 0x11b   :  { %474 = vmatprep.mubr.bf16.mxu1 %v237_v22 }
 0x11c   :  { %475 = vmatmul.mubr.bf16.vlgmr.msra.gmra.mrb[0].mxu1 %v236_v23 }
 0x1ef   :  { %v476_v28 = vpop.f32.mrb[0].mxu1 }
 0x1f0   :  { %v477_v29 = vadd.f32 %v476_v28, %v275_v25  ;;  %v478_v31 = vpop.f32.mrb[1].mxu1 }
 0x1f1   :  { %v479_v32 = vadd.f32 %v478_v31, %v279_v27  ;;  %v480_v34 = vpop.f32.mrb[2].mxu1 }
 0x1f2   :  { %v483_v35 = vmax.f32 %v477_v29, 0.0  ;;  %v481_v36 = vpop.f32.mrb[3].mxu1 }
 0x1f3   :  { %v484_v37 = vmax.f32 %v479_v32, 0.0 }
 0x1f4   :  { %v497_v38 = vmul.f32 %v490_v30, %v483_v35 }
 0x1f5   :  { %v498_v39 = vmul.f32 %v494_v33, %v484_v37 }
 0x1f7   :  { %v499_v40 = vadd.f32 %v498_v39, %v497_v38 }
 0x1f9   :  { %500 = vadd.xlane.f32.xlu1 %v499_v40 }
 0x286   :  { %v501_v42 = vpop.xlane.xlu1 %500 }
 0x287   :  { %v509_v43 = vadd.f32 %v561_v41, %v501_v42 }
 0x289   :  { %511 = vst.msk [vmem:[%s801_s9] sm:$0xff] %vm510_vm1, %v509_v43 }
 0x28a   :  { %516 = vsyncpa [#allocation4], 1 }
 0x28b   :  { %517 = vsyncpa [#allocation6], 1 }

</bundles_post_ra>
